<compile_context>
chip_gen: v5e
topology: v5e:2x2
jax: 0.10.0
libtpu: 0.0.40
codegen_flags: <defaults>
</compile_context>

<pallas_src>
import jax
import jax.numpy as jnp
from jax.experimental import pallas as pl
from jax.experimental.pallas import tpu as pltpu

CHANNEL_NUMBER = 0   # module default
CLASS_IDX = 0        # module default
LOGIT_COEFF = 0.1


def _make_kernel(batch, hw):
    inv_bhw = 1.0 / float(batch * hw)          # folds both means over HW and B
    logit_scale = LOGIT_COEFF / float(batch)   # folds 0.1 and the batch mean

    def kernel(x_ref, dec_ref, out_ref, acc_ref):
        k = pl.program_id(0)

        @pl.when(k == 0)
        def _init():
            acc_ref[...] = jnp.zeros_like(acc_ref)

        # x_ref: [B, 1, tile_s, 128] -- the selected channel only (sliced by BlockSpec).
        x = x_ref[...].astype(jnp.float32)
        acc_ref[...] += jnp.sum(x).reshape(1, 1)

        @pl.when(k == pl.num_programs(0) - 1)
        def _finalize():
            dec_sum = jnp.sum(dec_ref[...].astype(jnp.float32))   # sum_b logits[b]
            # loss = -( sum_x / (B*HW) + 0.1 * sum_logits / B )
            out_ref[...] = -(acc_ref[...] * inv_bhw + dec_sum * logit_scale)

    return kernel


def _pick_tile_s(s):
    """Largest multiple-of-8 divisor of s up to 64 sublanes (8192 lanes/step); else s."""
    if s % 8 != 0:
        return s
    t = min(s, 64)
    t -= t % 8
    while t >= 8:
        if s % t == 0:
            return t
        t -= 8
    return s


def channel_objective(layer_out, decision_out,
                      channel_number=CHANNEL_NUMBER, class_idx=CLASS_IDX):
    """layer_out: [B, C, H, W] (NCHW), decision_out: [B, num_classes] -> scalar loss."""
    B, C, H, W = layer_out.shape
    hw = H * W

    # Class column only (tiny [B, 1] slice; removes the num_classes-wide DMA input).
    dec = decision_out[:, class_idx:class_idx + 1]

    if hw % 128 == 0:
        # Pure view: lane axis = 128, spatial-chunk axis packs the sublanes.
        x = layer_out.reshape(B, C, hw // 128, 128)
        ch_block = channel_number
    else:
        # Fallback: slice the channel in the wrapper and zero-pad to a lane multiple
        # (padded zeros do not change the sum; the true hw is used for the mean).
        xc = layer_out[:, channel_number].reshape(B, hw)
        pad = (-hw) % 128
        xc = jnp.pad(xc, ((0, 0), (0, pad)))
        x = xc.reshape(B, 1, (hw + pad) // 128, 128)
        ch_block = 0

    S = x.shape[2]
    tile_s = _pick_tile_s(S)
    grid = (S // tile_s,)

    kernel = _make_kernel(B, hw)

    out = pl.pallas_call(
        kernel,
        out_shape=jax.ShapeDtypeStruct((1, 1), jnp.float32),
        grid=grid,
        in_specs=[
            # Only the selected channel: block dim 1 on the channel axis at index ch_block;
            # the spatial-chunk axis is the (pipelined) reduction grid axis.
            pl.BlockSpec((B, 1, tile_s, 128), lambda k: (0, ch_block, k, 0)),
            pl.BlockSpec((B, 1), lambda k: (0, 0)),
        ],
        out_specs=pl.BlockSpec((1, 1), lambda k: (0, 0)),
        scratch_shapes=[pltpu.VMEM((1, 1), jnp.float32)],
        compiler_params=pltpu.CompilerParams(
            dimension_semantics=("arbitrary",)),
    )(x, dec)
    return out[0, 0]


def _reference(layer_out, decision_out,
               channel_number=CHANNEL_NUMBER, class_idx=CLASS_IDX):
    B, C, H, W = layer_out.shape
    act = layer_out.reshape(B, C, -1).mean(axis=-1)[:, channel_number]
    logits = decision_out[:, class_idx]
    return jnp.mean(-(act + LOGIT_COEFF * logits))


if __name__ == "__main__":
    key = jax.random.PRNGKey(0)
    k1, k2 = jax.random.split(key)
    # Small shapes consistent with the module's forward: B=2, C=4, H=W=16, 8 classes.
    layer_out = jax.random.normal(k1, (2, 4, 16, 16), dtype=jnp.float32)
    decision_out = jax.random.normal(k2, (2, 8), dtype=jnp.float32)

    loss = channel_objective(layer_out, decision_out)
    jax.block_until_ready(loss)

    ref = _reference(layer_out, decision_out)
    assert jnp.allclose(loss, ref, atol=1e-5, rtol=1e-5), (loss, ref)

    # TODO(synk): activation_map() (bilinear interpolation + thresholding) is not
    # part of the forward/__call__ loss path and is not implemented here.
    print("KERNEL_OK")
</pallas_src>

<mosaic_0001>
module attributes {stable_mosaic.version = 11 : i64} {
  func.func @kernel(%arg0: i32, %arg1: memref<2x1x2x128xf32, #tpu.memory_space<vmem>>, %arg2: memref<2x1xf32, #tpu.memory_space<vmem>>, %arg3: memref<1x1xf32, #tpu.memory_space<vmem>>, %arg4: memref<1x1xf32, #tpu.memory_space<vmem>>) attributes {dimension_semantics = [#tpu.dimension_semantics<arbitrary>], iteration_bounds = array<i64: 1>, scalar_prefetch = 0 : i64, scratch_operands = 1 : i64, tpu.core_type = #tpu.core_type<tc>, window_params = [{transform_indices = @transform_0, window_bounds = array<i64: 2, 1, 2, 128>}, {pipeline_mode = #tpu.pipeline_mode<synchronous>, transform_indices = @transform_1, window_bounds = array<i64: 2, 1>}, {pipeline_mode = #tpu.pipeline_mode<synchronous>, transform_indices = @transform_2, window_bounds = array<i64: 1, 1>}]} {
    %c0_i32 = arith.constant 0 : i32
    %0 = arith.cmpi eq, %arg0, %c0_i32 : i32
    %1 = arith.extui %0 : i1 to i32
    %c0_i32_0 = arith.constant 0 : i32
    %2 = arith.cmpi ne, %1, %c0_i32_0 : i32
    scf.if %2 {
      %cst_10 = arith.constant 0.000000e+00 : f32
      %15 = vector.broadcast %cst_10 : f32 to vector<1x1xf32>
      %c0_11 = arith.constant 0 : index
      %c0_12 = arith.constant 0 : index
      %16 = vector.load %arg4[%c0_11, %c0_12] : memref<1x1xf32, #tpu.memory_space<vmem>>, vector<1x1xf32>
      tpu.vector_store %arg4[%c0_11, %c0_12], %15 {strides = array<i32>} : memref<1x1xf32, #tpu.memory_space<vmem>>, vector<1x1xf32>,
    } else {
    }
    %c0 = arith.constant 0 : index
    %c0_1 = arith.constant 0 : index
    %c0_2 = arith.constant 0 : index
    %c0_3 = arith.constant 0 : index
    %3 = vector.load %arg1[%c0, %c0_1, %c0_2, %c0_3] : memref<2x1x2x128xf32, #tpu.memory_space<vmem>>, vector<2x1x2x128xf32>
    %c0_4 = arith.constant 0 : index
    %c0_5 = arith.constant 0 : index
    %4 = vector.load %arg4[%c0_4, %c0_5] : memref<1x1xf32, #tpu.memory_space<vmem>>, vector<1x1xf32>
    %5 = vector.shape_cast %3 : vector<2x1x2x128xf32> to vector<1x2x1x2x128xf32>
    %cst = arith.constant dense<0.000000e+00> : vector<1xf32>
    %6 = vector.multi_reduction <add>, %5, %cst [1, 2, 3, 4] : vector<1x2x1x2x128xf32> to vector<1xf32>
    %7 = vector.shape_cast %6 : vector<1xf32> to vector<1x1x1x1x1xf32>
    %8 = vector.extract %7[0, 0, 0, 0, 0] : f32 from vector<1x1x1x1x1xf32>
    %9 = vector.broadcast %8 : f32 to vector<1x1xf32>
    %10 = arith.addf %4, %9 : vector<1x1xf32>
    %c0_6 = arith.constant 0 : index
    %c0_7 = arith.constant 0 : index
    %11 = vector.load %arg4[%c0_6, %c0_7] : memref<1x1xf32, #tpu.memory_space<vmem>>, vector<1x1xf32>
    tpu.vector_store %arg4[%c0_6, %c0_7], %10 {strides = array<i32>} : memref<1x1xf32, #tpu.memory_space<vmem>>, vector<1x1xf32>,
    %c0_i32_8 = arith.constant 0 : i32
    %12 = arith.cmpi eq, %arg0, %c0_i32_8 : i32
    %13 = arith.extui %12 : i1 to i32
    %c0_i32_9 = arith.constant 0 : i32
    %14 = arith.cmpi ne, %13, %c0_i32_9 : i32
    scf.if %14 {
      %c0_10 = arith.constant 0 : index
      %c0_11 = arith.constant 0 : index
      %15 = vector.load %arg2[%c0_10, %c0_11] : memref<2x1xf32, #tpu.memory_space<vmem>>, vector<2x1xf32>
      %16 = vector.shape_cast %15 : vector<2x1xf32> to vector<1x2x1xf32>
      %cst_12 = arith.constant dense<0.000000e+00> : vector<1xf32>
      %17 = vector.multi_reduction <add>, %16, %cst_12 [1, 2] : vector<1x2x1xf32> to vector<1xf32>
      %18 = vector.shape_cast %17 : vector<1xf32> to vector<1x1x1xf32>
      %19 = vector.extract %18[0, 0, 0] : f32 from vector<1x1x1xf32>
      %c0_13 = arith.constant 0 : index
      %c0_14 = arith.constant 0 : index
      %20 = vector.load %arg4[%c0_13, %c0_14] : memref<1x1xf32, #tpu.memory_space<vmem>>, vector<1x1xf32>
      %cst_15 = arith.constant 0.001953125 : f32
      %21 = vector.broadcast %cst_15 : f32 to vector<1x1xf32>
      %22 = arith.mulf %20, %21 : vector<1x1xf32>
      %cst_16 = arith.constant 5.000000e-02 : f32
      %23 = arith.mulf %19, %cst_16 : f32
      %24 = vector.broadcast %23 : f32 to vector<1x1xf32>
      %25 = arith.addf %22, %24 : vector<1x1xf32>
      %cst_17 = arith.constant 0.000000e+00 : f32
      %26 = vector.broadcast %cst_17 : f32 to vector<1x1xf32>
      %27 = arith.subf %26, %25 : vector<1x1xf32>
      %c0_18 = arith.constant 0 : index
      %c0_19 = arith.constant 0 : index
      %28 = vector.load %arg3[%c0_18, %c0_19] : memref<1x1xf32, #tpu.memory_space<vmem>>, vector<1x1xf32>
      tpu.vector_store %arg3[%c0_18, %c0_19], %27 {strides = array<i32>} : memref<1x1xf32, #tpu.memory_space<vmem>>, vector<1x1xf32>,
    } else {
    }
    return
  }
  func.func @transform_0(%arg0: i32) -> (i32, i32, i32, i32) {
    %c0_i32 = arith.constant 0 : i32
    %c0_i32_0 = arith.constant 0 : i32
    %c0_i32_1 = arith.constant 0 : i32
    %c0_i32_2 = arith.constant 0 : i32
    return %c0_i32, %c0_i32_0, %arg0, %c0_i32_1 : i32, i32, i32, i32
  }
  func.func @transform_1(%arg0: i32) -> (i32, i32) {
    %c0_i32 = arith.constant 0 : i32
    %c0_i32_0 = arith.constant 0 : i32
    %c0_i32_1 = arith.constant 0 : i32
    return %c0_i32, %c0_i32_0 : i32, i32
  }
  func.func @transform_2(%arg0: i32) -> (i32, i32) {
    %c0_i32 = arith.constant 0 : i32
    %c0_i32_0 = arith.constant 0 : i32
    %c0_i32_1 = arith.constant 0 : i32
    return %c0_i32, %c0_i32_0 : i32, i32
  }
}

</mosaic_0001>

<bundles_post_ra>
// kernel: tpu_custom_call.1
= control target key start
LH: loop header
LB: loop body
LE: loop exit
PB: predicated region body
PF: predicated region fallthrough
CT: control target
= control target key end

     0   :  { %7 = vsyncpa [#allocation4], 0  ;;  %s188_s0 = inlined_call_operand.hbm [shape: f32[2,4,2,128], index: 0, kind: input, shape index: {}]   ;;  %s189_s1 = inlined_call_operand.vmem [shape: f32[2,1], index: 1, kind: input, shape index: {}]   ;;  %s190_s2 = inlined_call_operand.hbm [shape: f32[1,1], index: 2, kind: output, shape index: {}]  }
   0x1   :  { %8 = vsyncpa [#allocation5], 0  ;;  %s13_s11 = sshll.u32 %s188_s0, 4  ;;  %s155_s12 = smov [#allocation3]   ;;  %s14_s11 = int_to_ptr.hbm [resolvable:$true] %s13_s11 }
   0x2   :  { %s15_s13 = sshll.u32 %s155_s12, 4  ;;  %s156_s14 = smov 128   ;;  %s16_s13 = int_to_ptr.vmem [resolvable:$true] %s15_s13 }
   0x3   :  { %s157_s15 = smov 32   ;;  %s158_s16 = smov 2  }
   0x4   :  { %21 = dma.hbm_to_vmem [thread:$0]  %s14_s11, 64, %s16_s13, [#allocation4], %s156_s14, %s157_s15, %s158_s16  }
   0x5   :  { %151 = dma.done.wait [#allocation4], 64  }
   0x6   :  { %152 = vsyncadd [#allocation4], 4294967232  ;;  %vm37_vm0 = vcmask 1041408   ;;  %v34_v0 = vld [vmem:[#allocation3] sm:$0x3]  ;;  %vm58_vm1 = vcmask 1024  }
   0x7   :  { %v35_v1 = vld [vmem:[#allocation3 + $0x2] sm:$0x3]  ;;  %v38_v2 = vsel %vm37_vm0, %v34_v0, 0.0  ;;  %v57_v5 = vld [vmem:[%s189_s1] sm:$0x3]  ;;  %vm32_vm2 = vcmask 0  }
   0x8   :  { %v39_v3 = vsel %vm37_vm0, %v35_v1, 0.0  ;;  %v59_v6 = vsel %vm58_vm1, %v57_v5, 0.0  ;;  %v159_v7 = vmov 0.0   ;;  %s160_s20 = smov [#allocation6]   ;;  %s83_s24 = sshll.u32 %s190_s2, 4  ;;  %s84_s24 = int_to_ptr.hbm [resolvable:$true] %s83_s24 }
   0x9   :  { %v40_v4 = vadd.f32 %v39_v3, %v38_v2  ;;  %33 = vst.msk [vmem:[#allocation2] sm:$0x1] %vm32_vm2, %v159_v7  ;;  %s81_s21 = sshll.u32 %s160_s20, 4  ;;  %s82_s21 = int_to_ptr.vmem [resolvable:$true] %s81_s21 }
   0xb   :  { %41 = vadd.xlane.f32.xlu0 %v40_v4 }
  0x10   :  { %v36_v22 = vld [vmem:[#allocation2] sm:$0x1] }
  0x13   :  { %60 = vadd.xlane.f32.xlu0 %v59_v6 }
  0x7e   :  { %v42_v8 = vpop.xlane.xlu0 %41 }
  0x7f   :  { %v43_v9 = vrot.slane %v42_v8, 4 }
  0x81   :  { %v44_v10 = vadd.f32 %v43_v9, %v42_v8 }
  0x83   :  { %v45_v11 = vrot.slane %v44_v10, 2 }
  0x85   :  { %v46_v12 = vadd.f32 %v45_v11, %v44_v10 }
  0x86   :  { %v61_v13 = vpop.xlane.xlu0 %60 }
  0x87   :  { %v62_v14 = vrot.slane %v61_v13, 4  ;;  %v47_v15 = vrot.slane %v46_v12, 1 }
  0x89   :  { %v63_v16 = vadd.f32 %v62_v14, %v61_v13  ;;  %v48_v17 = vadd.f32 %v47_v15, %v46_v12 }
  0x8b   :  { %v64_v18 = vrot.slane %v63_v16, 2  ;;  %93 = vpush %v48_v17 }
  0x8d   :  { %v65_v19 = vadd.f32 %v64_v18, %v63_v16 }
  0x8f   :  { %v66_v20 = vrot.slane %v65_v19, 1 }
  0x91   :  { %v67_v21 = vadd.f32 %v66_v20, %v65_v19 }
  0x93   :  { %95 = vpush %v67_v21 }
  0xbc   :  { %s94_s0 = spop %93 }
  0xbd   :  { %v50_v23 = vstv %s94_s0 }
  0xbe   :  { %v51_v24 = vadd.f32 %v50_v23, %v36_v22 }
  0xc0   :  { %53 = vst.msk [vmem:[#allocation2] sm:$0x1] %vm32_vm2, %v51_v24 }
  0xc4   :  { %s96_s1 = spop %95 }
  0xc5   :  { %s71_s19 = smul.f32 0.05, %s96_s1 }
  0xc7   :  { %v69_v25 = vld [vmem:[#allocation2] sm:$0x1]  ;;  %v72_v27 = vstv %s71_s19 }
  0xc8   :  { %v70_v26 = vmul.f32 0.001953125, %v69_v25 }
  0xca   :  { %v73_v28 = vadd.f32 %v72_v27, %v70_v26 }
  0xcc   :  { %v74_v29 = vsub.f32 0.0, %v73_v28 }
  0xce   :  { %75 = vst.msk [vmem:[#allocation6] sm:$0x1] %vm32_vm2, %v74_v29 }
  0xcf   :  { %86 = dma.vmem_to_hbm [thread:$0]  %s82_s21, 16, %s84_s24, [#allocation5]  }
  0xd0   :  { %153 = dma.done.wait [#allocation5], 16  }
  0xd1   :  { %154 = vsyncadd [#allocation5], 4294967280 }
  0xd2   :  { %91 = vsyncpa [#allocation4], 1 }
  0xd3   :  { %92 = vsyncpa [#allocation5], 1 }

</bundles_post_ra>
